<compile_context>
chip_gen: v6e
topology: v6e:2x2x1
jax: 0.10.0
libtpu: 0.0.40
codegen_flags: <defaults>
</compile_context>

<pallas_src>
import jax
import jax.numpy as jnp
from jax import lax
from jax.experimental import pallas as pl
from jax.experimental.pallas import tpu as pltpu


# ----------------------------- Pallas kernel --------------------------------


def _atten_kernel(dec_ref, ctx_ref, w_in_ref, w_oc_ref, w_od_ref, b_ref,
                  y_ref, att_ref):
    """Fused attention for one batch element.

    dec_ref : (1, Y, D)   decoder outputs ("output" arg of the module)
    ctx_ref : (1, X, C)   encoder context, C = 2 * encoder_hidden
    w_in_ref: (C, D)      fc_in.weight^T            (no bias)
    w_oc_ref: (C, D)      fc_out.weight[:, :C]^T    (acts on attended context)
    w_od_ref: (D, D)      fc_out.weight[:, C:]^T    (acts on decoder output)
    b_ref   : (1, D)      fc_out.bias
    y_ref   : (1, Y, D)   tanh(fc_out([ctx, output]))
    att_ref : (1, Y, X)   softmax attention weights
    """
    hp = lax.Precision.HIGHEST

    dec = dec_ref[0]                                     # (Y, D)
    ctx = ctx_ref[0]                                     # (X, C)

    # fc_in: context_in = context @ W_in^T               (X, D)
    ctx_in = jnp.dot(ctx, w_in_ref[...], precision=hp,
                     preferred_element_type=jnp.float32)

    # attention scores = output @ context_in^T           (Y, X)
    scores = lax.dot_general(dec, ctx_in, (((1,), (1,)), ((), ())),
                             precision=hp,
                             preferred_element_type=jnp.float32)

    # softmax over the context (last) axis
    m = jnp.max(scores, axis=-1, keepdims=True)
    e = jnp.exp(scores - m)
    probs = e / jnp.sum(e, axis=-1, keepdims=True)       # (Y, X)

    # attended context = probs @ context                 (Y, C)
    attended = jnp.dot(probs, ctx, precision=hp,
                       preferred_element_type=jnp.float32)

    # fc_out on concat([attended, output]) without materializing the concat
    y = jnp.tanh(
        jnp.dot(attended, w_oc_ref[...], precision=hp,
                preferred_element_type=jnp.float32)
        + jnp.dot(dec, w_od_ref[...], precision=hp,
                  preferred_element_type=jnp.float32)
        + b_ref[...])                                    # (Y, D)

    y_ref[0] = y
    att_ref[0] = probs


# ------------------------------- wrapper -------------------------------------


def atten_forward(params, dec_out, context):
    """Pallas implementation of Atten.forward.

    dec_out : (B, Y, D)  -- PyTorch arg `output`
    context : (B, X, C)  -- PyTorch arg `context`, C = 2 * encoder_hidden
    returns (out (B, Y, D), atten (B, Y, X))
    """
    B, Y, D = dec_out.shape
    _, X, C = context.shape

    # host-side weight re-layout (one-time, outside the kernel)
    w_in_t = params["w_in"].T                 # (C, D)
    w_oc_t = params["w_out"][:, :C].T         # (C, D)  part acting on context
    w_od_t = params["w_out"][:, C:].T         # (D, D)  part acting on output
    b_out = params["b_out"].reshape(1, D)     # (1, D)

    y, att = pl.pallas_call(
        _atten_kernel,
        out_shape=(jax.ShapeDtypeStruct((B, Y, D), jnp.float32),
                   jax.ShapeDtypeStruct((B, Y, X), jnp.float32)),
        grid_spec=pltpu.PrefetchScalarGridSpec(
            num_scalar_prefetch=0,
            grid=(B,),
            in_specs=[
                pl.BlockSpec((1, Y, D), lambda b: (b, 0, 0)),
                pl.BlockSpec((1, X, C), lambda b: (b, 0, 0)),
                pl.BlockSpec((C, D), lambda b: (0, 0)),
                pl.BlockSpec((C, D), lambda b: (0, 0)),
                pl.BlockSpec((D, D), lambda b: (0, 0)),
                pl.BlockSpec((1, D), lambda b: (0, 0)),
            ],
            out_specs=[
                pl.BlockSpec((1, Y, D), lambda b: (b, 0, 0)),
                pl.BlockSpec((1, Y, X), lambda b: (b, 0, 0)),
            ]),
        compiler_params=pltpu.CompilerParams(
            dimension_semantics=("parallel",)),   # v7x: one batch elem per TC
    )(dec_out, context, w_in_t, w_oc_t, w_od_t, b_out)
    return y, att


# --------------------------- pure-JAX reference -------------------------------


def atten_ref(params, dec_out, context):
    B, Y, D = dec_out.shape
    _, X, C = context.shape
    hp = lax.Precision.HIGHEST

    x = context.reshape(B * X, C)
    x = jnp.dot(x, params["w_in"].T, precision=hp)
    context_in = x.reshape(B, X, D)

    att = jnp.einsum("byd,bxd->byx", dec_out, context_in, precision=hp)
    att = jax.nn.softmax(att, axis=2)
    ctx = jnp.einsum("byx,bxc->byc", att, context, precision=hp)

    cat = jnp.concatenate([ctx, dec_out], axis=2).reshape(B * Y, C + D)
    out = jnp.tanh(jnp.dot(cat, params["w_out"].T, precision=hp)
                   + params["b_out"])
    return out.reshape(B, Y, D), att


# --------------------------------- main ---------------------------------------


def init_params(key, encoder_hidden_size, decoder_hidden_size):
    C = 2 * encoder_hidden_size
    D = decoder_hidden_size
    k1, k2, k3 = jax.random.split(key, 3)
    s_in = 1.0 / (C ** 0.5)
    s_out = 1.0 / ((C + D) ** 0.5)
    u = lambda k, shape, s: jax.random.uniform(
        k, shape, jnp.float32, minval=-s, maxval=s)
    return {
        "w_in": u(k1, (D, C), s_in),          # fc_in.weight  (no bias)
        "w_out": u(k2, (D, C + D), s_out),    # fc_out.weight
        "b_out": u(k3, (D,), s_out),          # fc_out.bias
    }


if __name__ == "__main__":
    B = 2
    encoder_hidden_size = 32
    decoder_hidden_size = 32
    C = 2 * encoder_hidden_size     # 64
    D = decoder_hidden_size         # 32
    Y, X = 8, 16                    # decoder / encoder sequence lengths

    key = jax.random.PRNGKey(0)
    pkey, dkey, ckey = jax.random.split(key, 3)
    params = init_params(pkey, encoder_hidden_size, decoder_hidden_size)
    dec_out = jax.random.normal(dkey, (B, Y, D), jnp.float32)
    context = jax.random.normal(ckey, (B, X, C), jnp.float32)

    out, att = jax.jit(atten_forward)(params, dec_out, context)
    jax.block_until_ready((out, att))

    # shape checks (match PyTorch: output (B, Y, D), atten (B, Y, X))
    assert out.shape == (B, Y, D), out.shape
    assert att.shape == (B, Y, X), att.shape

    # numerical check against a pure-JAX reference
    ref_out, ref_att = atten_ref(params, dec_out, context)
    assert bool(jnp.all(jnp.isfinite(out)))
    assert bool(jnp.all(jnp.isfinite(att)))
    assert bool(jnp.allclose(att, ref_att, atol=1e-3, rtol=1e-3))
    assert bool(jnp.allclose(out, ref_out, atol=1e-3, rtol=1e-3))
    # attention rows are a distribution
    assert bool(jnp.allclose(jnp.sum(att, axis=-1), 1.0, atol=1e-4))

    print("KERNEL_OK")
</pallas_src>

<mosaic_0001>
module attributes {stable_mosaic.version = 11 : i64} {
  func.func @_atten_kernel(%arg0: i32, %arg1: memref<1x8x32xf32, #tpu.memory_space<vmem>>, %arg2: memref<1x16x64xf32, #tpu.memory_space<vmem>>, %arg3: memref<64x32xf32, #tpu.memory_space<vmem>>, %arg4: memref<64x32xf32, #tpu.memory_space<vmem>>, %arg5: memref<32x32xf32, #tpu.memory_space<vmem>>, %arg6: memref<1x32xf32, #tpu.memory_space<vmem>>, %arg7: memref<1x8x32xf32, #tpu.memory_space<vmem>>, %arg8: memref<1x8x16xf32, #tpu.memory_space<vmem>>) attributes {dimension_semantics = [#tpu.dimension_semantics<parallel>], iteration_bounds = array<i64: 2>, scalar_prefetch = 0 : i64, scratch_operands = 0 : i64, tpu.core_type = #tpu.core_type<tc>, window_params = [{transform_indices = @transform_0, window_bounds = array<i64: 1, 8, 32>}, {transform_indices = @transform_1, window_bounds = array<i64: 1, 16, 64>}, {pipeline_mode = #tpu.pipeline_mode<synchronous>, transform_indices = @transform_2, window_bounds = array<i64: 64, 32>}, {pipeline_mode = #tpu.pipeline_mode<synchronous>, transform_indices = @transform_3, window_bounds = array<i64: 64, 32>}, {pipeline_mode = #tpu.pipeline_mode<synchronous>, transform_indices = @transform_4, window_bounds = array<i64: 32, 32>}, {pipeline_mode = #tpu.pipeline_mode<synchronous>, transform_indices = @transform_5, window_bounds = array<i64: 1, 32>}, {transform_indices = @transform_6, window_bounds = array<i64: 1, 8, 32>}, {transform_indices = @transform_7, window_bounds = array<i64: 1, 8, 16>}]} {
    %c0 = arith.constant 0 : index
    %c0_0 = arith.constant 0 : index
    %c0_1 = arith.constant 0 : index
    %0 = vector.load %arg1[%c0, %c0_0, %c0_1] : memref<1x8x32xf32, #tpu.memory_space<vmem>>, vector<1x8x32xf32>
    %1 = vector.shape_cast %0 : vector<1x8x32xf32> to vector<8x32xf32>
    %c0_2 = arith.constant 0 : index
    %c0_3 = arith.constant 0 : index
    %c0_4 = arith.constant 0 : index
    %2 = vector.load %arg2[%c0_2, %c0_3, %c0_4] : memref<1x16x64xf32, #tpu.memory_space<vmem>>, vector<1x16x64xf32>
    %3 = vector.shape_cast %2 : vector<1x16x64xf32> to vector<16x64xf32>
    %c0_5 = arith.constant 0 : index
    %c0_6 = arith.constant 0 : index
    %4 = vector.load %arg3[%c0_5, %c0_6] : memref<64x32xf32, #tpu.memory_space<vmem>>, vector<64x32xf32>
    %cst = arith.constant dense<0.000000e+00> : vector<16x32xf32>
    %5 = tpu.matmul %3, %4, %cst {dimension_numbers = #tpu.dot_dimension_numbers<[1], [0], [0], [1], [0, 0, 1, 1], [], []>, precision = #tpu.contract_precision<fp32>} : vector<16x64xf32>, vector<64x32xf32>, vector<16x32xf32> -> vector<16x32xf32>
    %cst_7 = arith.constant dense<0.000000e+00> : vector<8x16xf32>
    %6 = tpu.matmul %1, %5, %cst_7 {dimension_numbers = #tpu.dot_dimension_numbers<[1], [1], [0], [0], [0, 0, 1, 0], [], []>, precision = #tpu.contract_precision<fp32>} : vector<8x32xf32>, vector<16x32xf32>, vector<8x16xf32> -> vector<8x16xf32>
    %cst_8 = arith.constant dense<0xFF800000> : vector<8xf32>
    %7 = vector.multi_reduction <maximumf>, %6, %cst_8 [1] : vector<8x16xf32> to vector<8xf32>
    %8 = vector.shape_cast %7 : vector<8xf32> to vector<8x1xf32>
    %9 = vector.broadcast %8 : vector<8x1xf32> to vector<8x16xf32>
    %10 = arith.subf %6, %9 : vector<8x16xf32>
    %11 = math.exp %10 : vector<8x16xf32>
    %cst_9 = arith.constant dense<0.000000e+00> : vector<8xf32>
    %12 = vector.multi_reduction <add>, %11, %cst_9 [1] : vector<8x16xf32> to vector<8xf32>
    %13 = vector.shape_cast %12 : vector<8xf32> to vector<8x1xf32>
    %14 = vector.broadcast %13 : vector<8x1xf32> to vector<8x16xf32>
    %15 = arith.divf %11, %14 : vector<8x16xf32>
    %cst_10 = arith.constant dense<0.000000e+00> : vector<8x64xf32>
    %16 = tpu.matmul %15, %3, %cst_10 {dimension_numbers = #tpu.dot_dimension_numbers<[1], [0], [0], [1], [0, 0, 1, 1], [], []>, precision = #tpu.contract_precision<fp32>} : vector<8x16xf32>, vector<16x64xf32>, vector<8x64xf32> -> vector<8x64xf32>
    %c0_11 = arith.constant 0 : index
    %c0_12 = arith.constant 0 : index
    %17 = vector.load %arg4[%c0_11, %c0_12] : memref<64x32xf32, #tpu.memory_space<vmem>>, vector<64x32xf32>
    %cst_13 = arith.constant dense<0.000000e+00> : vector<8x32xf32>
    %18 = tpu.matmul %16, %17, %cst_13 {dimension_numbers = #tpu.dot_dimension_numbers<[1], [0], [0], [1], [0, 0, 1, 1], [], []>, precision = #tpu.contract_precision<fp32>} : vector<8x64xf32>, vector<64x32xf32>, vector<8x32xf32> -> vector<8x32xf32>
    %c0_14 = arith.constant 0 : index
    %c0_15 = arith.constant 0 : index
    %19 = vector.load %arg5[%c0_14, %c0_15] : memref<32x32xf32, #tpu.memory_space<vmem>>, vector<32x32xf32>
    %cst_16 = arith.constant dense<0.000000e+00> : vector<8x32xf32>
    %20 = tpu.matmul %1, %19, %cst_16 {dimension_numbers = #tpu.dot_dimension_numbers<[1], [0], [0], [1], [0, 0, 1, 1], [], []>, precision = #tpu.contract_precision<fp32>} : vector<8x32xf32>, vector<32x32xf32>, vector<8x32xf32> -> vector<8x32xf32>
    %21 = arith.addf %18, %20 : vector<8x32xf32>
    %c0_17 = arith.constant 0 : index
    %c0_18 = arith.constant 0 : index
    %22 = vector.load %arg6[%c0_17, %c0_18] : memref<1x32xf32, #tpu.memory_space<vmem>>, vector<1x32xf32>
    %23 = vector.broadcast %22 : vector<1x32xf32> to vector<8x32xf32>
    %24 = arith.addf %21, %23 : vector<8x32xf32>
    %25 = math.tanh %24 : vector<8x32xf32>
    %c0_19 = arith.constant 0 : index
    %c0_20 = arith.constant 0 : index
    %c0_21 = arith.constant 0 : index
    %26 = vector.load %arg7[%c0_19, %c0_20, %c0_21] : memref<1x8x32xf32, #tpu.memory_space<vmem>>, vector<1x8x32xf32>
    %27 = vector.shape_cast %26 : vector<1x8x32xf32> to vector<8x32xf32>
    %28 = vector.shape_cast %25 : vector<8x32xf32> to vector<1x8x32xf32>
    tpu.vector_store %arg7[%c0_19, %c0_20, %c0_21], %28 {strides = array<i32>} : memref<1x8x32xf32, #tpu.memory_space<vmem>>, vector<1x8x32xf32>,
    %c0_22 = arith.constant 0 : index
    %c0_23 = arith.constant 0 : index
    %c0_24 = arith.constant 0 : index
    %29 = vector.load %arg8[%c0_22, %c0_23, %c0_24] : memref<1x8x16xf32, #tpu.memory_space<vmem>>, vector<1x8x16xf32>
    %30 = vector.shape_cast %29 : vector<1x8x16xf32> to vector<8x16xf32>
    %31 = vector.shape_cast %15 : vector<8x16xf32> to vector<1x8x16xf32>
    tpu.vector_store %arg8[%c0_22, %c0_23, %c0_24], %31 {strides = array<i32>} : memref<1x8x16xf32, #tpu.memory_space<vmem>>, vector<1x8x16xf32>,
    return
  }
  func.func @transform_0(%arg0: i32) -> (i32, i32, i32) {
    %c0_i32 = arith.constant 0 : i32
    %c0_i32_0 = arith.constant 0 : i32
    %c0_i32_1 = arith.constant 0 : i32
    return %arg0, %c0_i32, %c0_i32_0 : i32, i32, i32
  }
  func.func @transform_1(%arg0: i32) -> (i32, i32, i32) {
    %c0_i32 = arith.constant 0 : i32
    %c0_i32_0 = arith.constant 0 : i32
    %c0_i32_1 = arith.constant 0 : i32
    return %arg0, %c0_i32, %c0_i32_0 : i32, i32, i32
  }
  func.func @transform_2(%arg0: i32) -> (i32, i32) {
    %c0_i32 = arith.constant 0 : i32
    %c0_i32_0 = arith.constant 0 : i32
    %c0_i32_1 = arith.constant 0 : i32
    return %c0_i32, %c0_i32_0 : i32, i32
  }
  func.func @transform_3(%arg0: i32) -> (i32, i32) {
    %c0_i32 = arith.constant 0 : i32
    %c0_i32_0 = arith.constant 0 : i32
    %c0_i32_1 = arith.constant 0 : i32
    return %c0_i32, %c0_i32_0 : i32, i32
  }
  func.func @transform_4(%arg0: i32) -> (i32, i32) {
    %c0_i32 = arith.constant 0 : i32
    %c0_i32_0 = arith.constant 0 : i32
    %c0_i32_1 = arith.constant 0 : i32
    return %c0_i32, %c0_i32_0 : i32, i32
  }
  func.func @transform_5(%arg0: i32) -> (i32, i32) {
    %c0_i32 = arith.constant 0 : i32
    %c0_i32_0 = arith.constant 0 : i32
    %c0_i32_1 = arith.constant 0 : i32
    return %c0_i32, %c0_i32_0 : i32, i32
  }
  func.func @transform_6(%arg0: i32) -> (i32, i32, i32) {
    %c0_i32 = arith.constant 0 : i32
    %c0_i32_0 = arith.constant 0 : i32
    %c0_i32_1 = arith.constant 0 : i32
    return %arg0, %c0_i32, %c0_i32_0 : i32, i32, i32
  }
  func.func @transform_7(%arg0: i32) -> (i32, i32, i32) {
    %c0_i32 = arith.constant 0 : i32
    %c0_i32_0 = arith.constant 0 : i32
    %c0_i32_1 = arith.constant 0 : i32
    return %arg0, %c0_i32, %c0_i32_0 : i32, i32, i32
  }
}

</mosaic_0001>

<bundles_post_ra>
// kernel: atten_forward.1
= control target key start
LH: loop header
LB: loop body
LE: loop exit
PB: predicated region body
PF: predicated region fallthrough
CT: control target
= control target key end

     0   :  { %13 = vsyncpa [#allocation3], 0  ;;  %s4590_s0 = inlined_call_operand.vmem [shape: f32[2,8,32], index: 0, kind: input, shape index: {}]   ;;  %s4591_s1 = inlined_call_operand.vmem [shape: f32[2,16,64], index: 1, kind: input, shape index: {}]   ;;  %s4592_s2 = inlined_call_operand.vmem [shape: f32[64,32], index: 2, kind: input, shape index: {}]   ;;  %s4593_s3 = inlined_call_operand.vmem [shape: f32[64,32], index: 3, kind: input, shape index: {}]   ;;  %s4594_s4 = inlined_call_operand.vmem [shape: f32[32,32], index: 4, kind: input, shape index: {}]   ;;  %s4595_s5 = inlined_call_operand.vmem [shape: f32[1,32], index: 5, kind: input, shape index: {}]   ;;  %s4596_s6 = inlined_call_operand.hbm [shape: f32[2,8,32], index: 6, kind: output, shape index: {0}]   ;;  %s4597_s7 = inlined_call_operand.hbm [shape: f32[2,8,16], index: 7, kind: output, shape index: {1}]  }
   0x1   :  { %15 = vsyncpa [#allocation3 + $0x1], 0 }
   0x2   :  { %16 = vsyncpa [#allocation5], 0 }
   0x3   :  { %18 = vsyncpa [#allocation5 + $0x1], 0  ;;  %s3792_s24 = smov 0   ;;  %s3794_s25 = smov 0  }
   0x4   :  { %s3796_s26 = smov 0   ;;  %s3798_s27 = smov 0  }
   0x5 LB: > { %s3813_s28 = sadd.s32 4294967295, %s3746_s27   ;;  %s3029_s29 = sadd.s32 4294967294, %s3746_s27   ;;  %s3746_s27 = sphi %s3798_s27, %s4607_s27   ;;  %s3742_s26 = sphi %s3796_s26, %s4606_s26   ;;  %s3738_s25 = sphi %s3794_s25, %s4605_s25   ;;  %s3734_s24 = sphi %s3792_s24, %s4604_s24  }
   0x6   : > { %s3817_s30 = sadd.s32 1, %s3746_s27   ;;  %s167_s8 = sadd.s32 1, %s3742_s26 }
   0x7   : > { %s164_s9 = ssub.s32 %s3746_s27, %s3817_s30  ;;  %p177_p0 = scmp.ne.s32.totalorder %s3742_s26, %s3738_s25 }
   0x8   : > { %p165_p1 = scmp.eq.s32.totalorder %s164_s9, 0  ;;  %p178_p2 = scmp.eq.s32.totalorder %s3813_s28, 1 }
   0x9   : > { %p183_p3 = scmp.ne.s32.totalorder %s3738_s25, %s3734_s24  ;;  %p184_p4 = scmp.eq.s32.totalorder %s3029_s29, 1 }
   0xa   : > { %s3828_s10 = scalar_select %p165_p1, %s3742_s26, %s167_s8  }
   0xb   : > { %p3830_p5 = por %p178_p2, %p177_p0  ;;  %p3834_p6 = por %p184_p4, %p183_p3 }
   0xc   : > { %p3032_p7 = scmp.ge.s32.totalorder %s3746_s27, 1  ;;  %p255_p8 = scmp.lt.s32.totalorder %s3746_s27, 3 }
   0xe   : > { %p256_p9 = pnand %p3032_p7, %p255_p8 }
   0xf   : > { %p296_p10 = scmp.lt.s32.totalorder (!%p256_p9), %s3813_s28, 1  ;;  %s4159_s9 = sand.u32 (!%p256_p9), 1, %s3738_s25  }
  0x10   : > { %259 = sbr.rel (%p256_p9) target bundleno = 1307 (0x51b), region = 44  ;;  %s4599_s13 = sshll.u32 (!%p256_p9), %s4159_s9, 3 }
  0x11   : > { %s4178_s18 = scalar_lea.vmem (!%p256_p9), [#allocation4], %s4599_s13  ;;  %s4598_s14 = sshll.u32 (!%p256_p9), %s3813_s28, 7 }
  0x12   : > { %s2924_s17 = scalar_lea.hbm (!%p256_p9), %s4597_s7, %s4598_s14  ;;  %s3750_s22 = smov (!%p256_p9), [#allocation4]  }
  0x15   : > { %v315_v0 = vld [vmem:[%s4592_s2 + $0x38] sm:$0xff]  ;;  %v314_v1 = vld [vmem:[%s4592_s2 + $0x30] sm:$0xff]  ;;  %v313_v2 = vld [vmem:[%s4592_s2 + $0x28] sm:$0xff]  ;;  %s3878_s15 = scalar_select %p296_p10, %s3813_s28, 1  ;;  %vm316_vm0 = vcmask 523264   ;;  %v3748_v62 = vmov 0.0  }
  0x16   : > { %v3850_v3 = vand.u32 4294901760, %v315_v0  ;;  %v3852_v4 = vand.u32 4294901760, %v314_v1  ;;  %v3854_v5 = vand.u32 4294901760, %v313_v2  ;;  %v312_v6 = vld [vmem:[%s4592_s2 + $0x20] sm:$0xff]  ;;  %v311_v7 = vld [vmem:[%s4592_s2 + $0x18] sm:$0xff]  ;;  %v310_v8 = vld [vmem:[%s4592_s2 + $0x10] sm:$0xff] }
  0x17   : > { %v3865_v9 = vand.u32 4294901760, %v312_v6  ;;  %v3867_v10 = vand.u32 4294901760, %v311_v7  ;;  %v3869_v11 = vand.u32 4294901760, %v310_v8  ;;  %v309_v12 = vld [vmem:[%s4592_s2 + $0x8] sm:$0xff]  ;;  %v308_v13 = vld [vmem:[%s4592_s2] sm:$0xff]  ;;  %s3045_s16 = sshll.u32 %s3878_s15, 4 }
  0x18   : > { %3226 = vmatprep.subr.mxu0 %v3850_v3  ;;  %v3882_v14 = vsub.f32 %v315_v0, %v3850_v3  ;;  %v3885_v15 = vsub.f32 %v314_v1, %v3852_v4  ;;  %v3887_v16 = vand.u32 4294901760, %v309_v12  ;;  %v3890_v17 = vsub.f32 %v313_v2, %v3854_v5  ;;  %s304_s19 = scalar_lea.vmem %s4591_s1, %s3045_s16  ;;  %s3035_s20 = sshll.u32 %s3878_s15, 3 }
  0x19   : > { %3227 = vmatpush3.msra.mxu0 %v3850_v3  ;;  %v3894_v18 = vsub.f32 %v312_v6, %v3865_v9  ;;  %v3898_v19 = vsub.f32 %v311_v7, %v3867_v10  ;;  %v3901_v20 = vsub.f32 %v310_v8, %v3869_v11  ;;  %v3913_v24 = vand.u32 4294901760, %v308_v13  ;;  %v3922_v26 = vld [vmem:[%s304_s19] sm:$0xff]  ;;  %v3937_v32 = vld [vmem:[%s304_s19 + $0x8] sm:$0xff]  ;;  %s299_s23 = scalar_lea.vmem %s4590_s0, %s3035_s20  ;;  %s2926_s19 = sshll.u32 %s4178_s18, 4  ;;  %s2927_s19 = int_to_ptr.vmem [resolvable:$true] %s2926_s19 }
  0x1a   : > { %3228 = vmatprep.subr.mxu0 %v3852_v4  ;;  %v3905_v21 = vand.u32 4294901760, %v3882_v14  ;;  %v3908_v22 = vand.u32 4294901760, %v3885_v15  ;;  %v3911_v23 = vand.u32 4294901760, %v3890_v17  ;;  %v3928_v28 = vsub.f32 %v309_v12, %v3887_v16  ;;  %v305_v2 = vld [vmem:[%s299_s23] sm:$0xff]  ;;  %s2900_s20 = scalar_lea.sflag [#allocation5], %s4159_s9  ;;  %s3656_s21 = scalar_lea.vmem %s2927_s19, 128 }
  0x1b   : > { %3229 = vmatpush3.msra.mxu0 %v3852_v4  ;;  %v3920_v25 = vand.u32 4294901760, %v3894_v18  ;;  %v3925_v27 = vand.u32 4294901760, %v3898_v19  ;;  %v318_v33 = vsel %vm316_vm0, %v3922_v26, 0  ;;  %v3945_v35 = vand.u32 4294901760, %v3901_v20  ;;  %p3657_p11 = scmp.ne.s32.totalorder %s2927_s19, %s3656_s21  ;;  %s3660_s23 = sshll.u32 %s3750_s22, 4  ;;  %s3661_s23 = int_to_ptr.vmem [resolvable:$false] %s3660_s23 }
  0x1c   : > { %3230 = vmatprep.subr.mxu0 %v3854_v5  ;;  %v436_v29 = vsub.f32 %v3882_v14, %v3905_v21  ;;  %v443_v30 = vsub.f32 %v3885_v15, %v3908_v22  ;;  %v450_v31 = vsub.f32 %v3890_v17, %v3911_v23  ;;  %v3942_v34 = vand.u32 4294901760, %v318_v33  ;;  %s3662_s29 = scalar_lea.vmem %s3661_s23, 256  ;;  %p3663_p0 = scmp.lt.s32.totalorder %s2927_s19, %s3661_s23 }
  0x1d   : > { %3231 = vmatpush3.msra.mxu0 %v3854_v5  ;;  %v457_v38 = vsub.f32 %v3894_v18, %v3920_v25  ;;  %v3951_v39 = vsub.f32 %v308_v13, %v3913_v24  ;;  %v321_v41 = vsel %vm316_vm0, %v3937_v32, 0  ;;  %v464_v43 = vsub.f32 %v3898_v19, %v3925_v27  ;;  %p3658_p12 = pnand %p3657_p11, %p3830_p5  ;;  %p3664_p1 = scmp.lt.s32.totalorder %s3662_s29, %s3656_s21 }
  0x1e   : > { %3232 = vmatprep.subr.mxu0 %v3865_v9  ;;  %v437_v36 = vand.u32 4294901760, %v436_v29  ;;  %v444_v37 = vand.u32 4294901760, %v443_v30  ;;  %v3955_v40 = vsub.f32 %v318_v33, %v3942_v34  ;;  %3261 = vmatprep.mubr.f32.mxu1 %v3942_v34  ;;  %v451_v42 = vand.u32 4294901760, %v450_v31 }
  0x1f   : > { %3233 = vmatpush3.msra.mxu0 %v3865_v9  ;;  %v3963_v44 = vand.u32 4294901760, %v321_v41  ;;  %v3966_v45 = vand.u32 4294901760, %v3928_v28  ;;  %v458_v47 = vand.u32 4294901760, %v457_v38  ;;  %v471_v49 = vsub.f32 %v3901_v20, %v3945_v35  ;;  %p3659_p13 = pneg %p3658_p12  ;;  %p3665_p2 = por %p3664_p1, %p3663_p0 }
  0x20   : > { %3234 = vmatprep.subr.mxu0 %v3867_v10  ;;  %3245 = vmatprep.subr.mxu1 %v437_v36  ;;  %v398_v46 = vand.u32 4294901760, %v3955_v40  ;;  %v3977_v50 = vand.u32 4294901760, %v3951_v39  ;;  %v465_v52 = vand.u32 4294901760, %v464_v43  ;;  %vm3749_vm1 = vmmov 0  }
  0x21   : > { %3235 = vmatpush3.msra.mxu0 %v3867_v10  ;;  %3246 = vmatpush3.msra.mxu1 %v437_v36  ;;  %v3972_v48 = vsub.f32 %v321_v41, %v3963_v44  ;;  %v478_v54 = vsub.f32 %v3928_v28, %v3966_v45  ;;  %v472_v57 = vand.u32 4294901760, %v471_v49  ;;  %vm903_vm2 = vcmask 261120   ;;  %p3666_p3 = pnand %p3665_p2, %p3659_p13 }
  0x22   : > { %3236 = vmatprep.subr.mxu0 %v3869_v11  ;;  %3247 = vmatprep.subr.mxu1 %v444_v37  ;;  %v399_v51 = vsub.f32 %v3955_v40, %v398_v46  ;;  %v485_v58 = vsub.f32 %v3951_v39, %v3977_v50  ;;  %v4122_v43 = vand.u32 4294901760, %v3922_v26  ;;  %vm1372_vm3 = vcmask 130048  }
  0x23   : > { %3237 = vmatpush3.msra.mxu0 %v3869_v11  ;;  %3248 = vmatpush3.msra.mxu1 %v444_v37  ;;  %v408_v53 = vand.u32 4294901760, %v3972_v48  ;;  %v479_v60 = vand.u32 4294901760, %v478_v54 }
  0x24   : > { %3238 = vmatprep.subr.mxu0 %v3887_v16  ;;  %3249 = vmatprep.subr.mxu1 %v451_v42  ;;  %v400_v55 = vand.u32 4294901760, %v399_v51  ;;  %v486_v61 = vand.u32 4294901760, %v485_v58 }
  0x25   : > { %3239 = vmatpush3.msra.mxu0 %v3887_v16  ;;  %3250 = vmatpush3.msra.mxu1 %v451_v42  ;;  %v409_v56 = vsub.f32 %v3972_v48, %v408_v53  ;;  %v4115_v42 = vand.u32 4294901760, %v3937_v32 }
  0x26   : > { %3240 = vmatprep.subr.mxu0 %v3913_v24  ;;  %3251 = vmatprep.subr.mxu1 %v458_v47 }
  0x27   : > { %3241 = vmatpush3.msra.mxu0 %v3913_v24  ;;  %3252 = vmatpush3.msra.mxu1 %v458_v47  ;;  %v410_v59 = vand.u32 4294901760, %v409_v56 }
  0x28   : > { %3242 = vmatprep.mubr.f32.mxu0 %v400_v55  ;;  %3253 = vmatprep.subr.mxu1 %v465_v52 }
  0x29   : > { %3264 = vmatprep.subr.mxu0 %v3882_v14  ;;  %3254 = vmatpush3.msra.mxu1 %v465_v52 }
  0x2a   : > { %3243 = vmatmul.mubr.f32.vlgmr.msra.gmra.mxu0 %v410_v59  ;;  %3255 = vmatprep.subr.mxu1 %v472_v57 }
  0x2b   : > { %3265 = vmatpush3.msra.mxu0 %v3882_v14  ;;  %3256 = vmatpush3.msra.mxu1 %v472_v57 }
  0x2c   : > { %3266 = vmatprep.subr.mxu0 %v3885_v15  ;;  %3257 = vmatprep.subr.mxu1 %v479_v60 }
  0x2d   : > { %3267 = vmatpush3.msra.mxu0 %v3885_v15  ;;  %3258 = vmatpush3.msra.mxu1 %v479_v60 }
  0x2e   : > { %3268 = vmatprep.subr.mxu0 %v3890_v17  ;;  %3259 = vmatprep.subr.mxu1 %v486_v61 }
  0x2f   : > { %3269 = vmatpush3.msra.mxu0 %v3890_v17  ;;  %3260 = vmatpush3.msra.mxu1 %v486_v61 }
  0x30   : > { %3270 = vmatprep.subr.mxu0 %v3894_v18  ;;  %3262 = vmatmul.mubr.f32.vlgmr.msra.gmra.mxu1 %v3963_v44 }
  0x31   : > { %3271 = vmatpush3.msra.mxu0 %v3894_v18  ;;  %3283 = vmatprep.subr.mxu1 %v3850_v3 }
  0x32   : > { %3272 = vmatprep.subr.mxu0 %v3898_v19  ;;  %3284 = vmatpush3.msra.mxu1 %v3850_v3 }
  0x33   : > { %3273 = vmatpush3.msra.mxu0 %v3898_v19  ;;  %3285 = vmatprep.subr.mxu1 %v3852_v4 }
  0x34   : > { %3274 = vmatprep.subr.mxu0 %v3901_v20  ;;  %3286 = vmatpush3.msra.mxu1 %v3852_v4 }
  0x35   : > { %3275 = vmatpush3.msra.mxu0 %v3901_v20  ;;  %3287 = vmatprep.subr.mxu1 %v3854_v5 }
  0x36   : > { %3276 = vmatprep.subr.mxu0 %v3928_v28  ;;  %3288 = vmatpush3.msra.mxu1 %v3854_v5 }
  0x37   : > { %3277 = vmatpush3.msra.mxu0 %v3928_v28  ;;  %3289 = vmatprep.subr.mxu1 %v3865_v9 }
  0x38   : > { %3278 = vmatprep.subr.mxu0 %v3951_v39  ;;  %3280 = vmatprep.mubr.f32.mxu0 %v3955_v40 }
  0x39   : > { %3279 = vmatpush3.msra.mxu0 %v3951_v39  ;;  %3290 = vmatpush3.msra.mxu1 %v3865_v9 }
  0x3a   : > { %3281 = vmatmul.mubr.f32.vlgmr.msra.gmra.mxu0 %v3972_v48  ;;  %3291 = vmatprep.subr.mxu1 %v3867_v10 }
  0x3b   : > { %3302 = vmatprep.subr.mxu0 %v3905_v21  ;;  %3292 = vmatpush3.msra.mxu1 %v3867_v10 }
  0x3c   : > { %3303 = vmatpush3.msra.mxu0 %v3905_v21  ;;  %3293 = vmatprep.subr.mxu1 %v3869_v11 }
  0x3d   : > { %3304 = vmatprep.subr.mxu0 %v3908_v22  ;;  %3294 = vmatpush3.msra.mxu1 %v3869_v11 }
  0x3e   : > { %3305 = vmatpush3.msra.mxu0 %v3908_v22  ;;  %3295 = vmatprep.subr.mxu1 %v3887_v16 }
  0x3f   : > { %3306 = vmatprep.subr.mxu0 %v3911_v23  ;;  %3296 = vmatpush3.msra.mxu1 %v3887_v16 }
  0x40   : > { %3307 = vmatpush3.msra.mxu0 %v3911_v23  ;;  %3297 = vmatprep.subr.mxu1 %v3913_v24 }
  0x41   : > { %3308 = vmatprep.subr.mxu0 %v3920_v25  ;;  %3298 = vmatpush3.msra.mxu1 %v3913_v24 }
  0x42   : > { %3299 = vmatprep.mubr.f32.mxu1 %v398_v46  ;;  %3309 = vmatpush3.msra.mxu0 %v3920_v25 }
  0x43   : > { %3300 = vmatmul.mubr.f32.vlgmr.msra.gmra.mxu1 %v408_v53  ;;  %3310 = vmatprep.subr.mxu0 %v3925_v27 }
  0x44   : > { %3321 = vmatprep.subr.mxu1 %v3850_v3  ;;  %3311 = vmatpush3.msra.mxu0 %v3925_v27 }
  0x45   : > { %3322 = vmatpush3.msra.mxu1 %v3850_v3  ;;  %3312 = vmatprep.subr.mxu0 %v3945_v35 }
  0x46   : > { %3323 = vmatprep.subr.mxu1 %v3852_v4  ;;  %3313 = vmatpush3.msra.mxu0 %v3945_v35 }
  0x47   : > { %3324 = vmatpush3.msra.mxu1 %v3852_v4  ;;  %3314 = vmatprep.subr.mxu0 %v3966_v45 }
  0x48   : > { %3325 = vmatprep.subr.mxu1 %v3854_v5  ;;  %3315 = vmatpush3.msra.mxu0 %v3966_v45 }
  0x49   : > { %3326 = vmatpush3.msra.mxu1 %v3854_v5  ;;  %3316 = vmatprep.subr.mxu0 %v3977_v50  ;;  %v905_v5 = vsel %vm903_vm2, %v305_v2, 0 }
  0x4a   : > { %3327 = vmatprep.subr.mxu1 %v3865_v9  ;;  %3317 = vmatpush3.msra.mxu0 %v3977_v50 }
  0x4b   : > { %3318 = vmatprep.mubr.f32.mxu0 %v3942_v34  ;;  %3328 = vmatpush3.msra.mxu1 %v3865_v9  ;;  %v4081_v9 = vand.u32 4294901760, %v905_v5 }
  0x4c   : > { %3319 = vmatmul.mubr.f32.vlgmr.msra.gmra.mxu0 %v3963_v44  ;;  %3329 = vmatprep.subr.mxu1 %v3867_v10 }
  0x4d   : > { %3330 = vmatpush3.msra.mxu1 %v3867_v10  ;;  %3337 = vmatprep.mubr.f32.mxu1 %v3942_v34 }
  0x4e   : > { %3331 = vmatprep.subr.mxu1 %v3869_v11  ;;  %3340 = vmatprep.subr.mxu0 %v3748_v62 }
  0x4f   : > { %3332 = vmatpush3.msra.mxu1 %v3869_v11  ;;  %3344 = vmatprep.mubr.msk.f32.mxu0 %vm3749_vm1, %v3748_v62 }
  0x50   : > { %3333 = vmatprep.subr.mxu1 %v3887_v16 }
  0x51   : > { %3334 = vmatpush3.msra.mxu1 %v3887_v16  ;;  %v4084_v16 = vsub.f32 %v905_v5, %v4081_v9  ;;  %v4143_v5 = vsub.f32 %v3937_v32, %v4115_v42  ;;  %v1857_v32 = vld [vmem:[%s4594_s4 + $0x18] sm:$0xff] }
  0x52   : > { %3335 = vmatprep.subr.mxu1 %v3913_v24 }
  0x53   : > { %3336 = vmatpush3.msra.mxu1 %v3913_v24  ;;  %v4087_v23 = vand.u32 4294901760, %v4084_v16 }
  0x54   : > { %3338 = vmatmul.mubr.f32.vlgmr.msra.gmra.mxu1 %v3963_v44  ;;  %3347 = vmatprep.subr.mxu1 %v3748_v62 }
  0x55   : > { %3351 = vmatprep.mubr.msk.f32.mxu1 %vm3749_vm1, %v3748_v62  ;;  %v983_v30 = vsub.f32 %v4084_v16, %v4087_v23 }
  0x57   : > { %v4094_v36 = vand.u32 4294901760, %v983_v30 }
  0xea   : > { %v3244_v63 = vpop.f32.mrf.mxu0 }
  0xec   : > { %v402_v0 = vpop.f32.mrf.mxu0 }
  0xf0   : > { %v3263_v1 = vpop.f32.mrf.mxu1 }
  0xf1   : > { %v530_v8 = vadd.f32 %v3263_v1, %v3244_v63 }
  0xf2   : > { %v523_v4 = vpop.f32.mrf.mxu1 }
  0xf3   : > { %v524_v11 = vadd.f32 %v523_v4, %v402_v0  ;;  %v4139_v4 = vsub.f32 %v3922_v26, %v4122_v43 }
  0xfa   : > { %v3282_v3 = vpop.f32.mrf.mxu0 }
  0xfb   : > { %v625_v12 = vadd.f32 %v3282_v3, %v530_v8 }
  0xfc   : > { %v617_v6 = vpop.f32.mrf.mxu0 }
  0xfd   : > { %v618_v14 = vadd.f32 %v617_v6, %v524_v11  ;;  %v1502_v6 = vand.u32 4294901760, %v4139_v4 }
  0xff   : > { %v1503_v8 = vsub.f32 %v4139_v4, %v1502_v6 }
 0x103   : > { %v3301_v7 = vpop.f32.mrf.mxu1 }
 0x104   : > { %v714_v15 = vadd.f32 %v3301_v7, %v625_v12  ;;  %v1495_v7 = vand.u32 4294901760, %v4143_v5  ;;  %v1504_v12 = vand.u32 4294901760, %v1503_v8  ;;  %v1847_v8 = vld [vmem:[%s4593_s3 + $0x8] sm:$0xff] }
 0x105   : > { %v705_v13 = vpop.f32.mrf.mxu1 }
 0x106   : > { %v706_v18 = vadd.f32 %v705_v13, %v618_v14  ;;  %v4161_v13 = vand.u32 4294901760, %v1857_v32  ;;  %v1856_v14 = vld [vmem:[%s4594_s4 + $0x10] sm:$0xff] }
 0x10c   : > { %v3320_v10 = vpop.f32.mrf.mxu0 }
 0x10d   : > { %v815_v19 = vadd.f32 %v3320_v10, %v714_v15  ;;  %v1496_v10 = vsub.f32 %v4143_v5, %v1495_v7 }
 0x10e   : > { %v808_v17 = vpop.f32.mrf.mxu0 }
 0x10f   : > { %v809_v21 = vadd.f32 %v808_v17, %v706_v18  ;;  %v1497_v11 = vand.u32 4294901760, %v1496_v10  ;;  %v4168_v18 = vsub.f32 %v1857_v32, %v4161_v13 }
 0x114   : > { %v3339_v20 = vpop.f32.mrf.mxu1 }
 0x115   : > { %v900_v22 = vadd.f32 %v3339_v20, %v815_v19  ;;  %v4170_v19 = vand.u32 4294901760, %v1856_v14  ;;  %v1855_v20 = vld [vmem:[%s4594_s4 + $0x8] sm:$0xff] }
 0x116   : > { %v893_v24 = vpop.f32.mrf.mxu1 }
 0x117   : > { %v911_v25 = vsel %vm903_vm2, %v900_v22, 0  ;;  %v894_v27 = vadd.f32 %v893_v24, %v809_v21  ;;  %v4182_v24 = vand.u32 4294901760, %v1855_v20 }
 0x118   : > { %v942_v28 = vand.u32 4294901760, %v911_v25 }
 0x119   : > { %v908_v29 = vsel %vm903_vm2, %v894_v27, 0  ;;  %v1964_v27 = vand.u32 4294901760, %v4168_v18 }
 0x11a   : > { %v1020_v31 = vsub.f32 %v911_v25, %v942_v28  ;;  %v945_v33 = vand.u32 4294901760, %v908_v29  ;;  %3341 = vmatpush3.xpose.msra.mxu0 %v942_v28  ;;  %v1854_v25 = vld [vmem:[%s4594_s4] sm:$0xff] }
 0x11b   : > { %3342 = vmatprep.subr.mxu0 %v3748_v62  ;;  %v4194_v30 = vand.u32 4294901760, %v1854_v25 }
 0x11c   : > { %v1021_v34 = vand.u32 4294901760, %v1020_v31  ;;  %v1027_v35 = vsub.f32 %v908_v29, %v945_v33 }
 0x11e   : > { %v1028_v37 = vand.u32 4294901760, %v1027_v35  ;;  %3343 = vmatpush3.xpose.msra.mxu0 %v945_v33  ;;  %v1022_v38 = vsub.f32 %v1020_v31, %v1021_v34 }
 0x11f   : > { %3354 = vmatprep.subr.mxu0 %v3748_v62 }
 0x120   : > { %v1023_v39 = vand.u32 4294901760, %v1022_v38  ;;  %v1029_v40 = vsub.f32 %v1027_v35, %v1028_v37  ;;  %v4210_v38 = vsub.f32 %v1854_v25, %v4194_v30 }
 0x121   : > { %3345 = vmatmul.mubr.f32.vlgmr.msra.gmra.mxu0 %v4094_v36 }
 0x122   : > { %3348 = vmatpush3.xpose.msra.mxu1 %v1023_v39  ;;  %3355 = vmatpush3.xpose.msra.mxu0 %v1020_v31  ;;  %v1030_v41 = vand.u32 4294901760, %v1029_v40 }
 0x123   : > { %3349 = vmatprep.subr.mxu1 %v3748_v62  ;;  %3356 = vmatprep.subr.mxu0 %v3748_v62 }
 0x124   : > { %3358 = vmatprep.mubr.msk.f32.mxu0 %vm3749_vm1, %v3748_v62 }
 0x126   : > { %3350 = vmatpush3.xpose.msra.mxu1 %v1030_v41  ;;  %3357 = vmatpush3.xpose.msra.mxu0 %v1027_v35 }
 0x127   : > { %3361 = vmatprep.subr.mxu1 %v3748_v62  ;;  %3368 = vmatprep.subr.mxu0 %v3748_v62 }
 0x129   : > { %3352 = vmatmul.mubr.f32.vlgmr.msra.gmra.mxu1 %v4081_v9  ;;  %3359 = vmatmul.mubr.f32.vlgmr.msra.gmra.mxu0 %v4084_v16 }
 0x12a   : > { %3362 = vmatpush3.xpose.msra.mxu1 %v942_v28  ;;  %3369 = vmatpush3.xpose.msra.mxu0 %v1021_v34  ;;  %v1965_v34 = vsub.f32 %v4168_v18, %v1964_v27 }
 0x12b   : > { %3363 = vmatprep.subr.mxu1 %v3748_v62  ;;  %3370 = vmatprep.subr.mxu0 %v3748_v62 }
 0x12c   : > { %3365 = vmatprep.mubr.msk.f32.mxu1 %vm3749_vm1, %v3748_v62  ;;  %3372 = vmatprep.mubr.msk.f32.mxu0 %vm3749_vm1, %v3748_v62  ;;  %v1966_v41 = vand.u32 4294901760, %v1965_v34 }
 0x12e   : > { %3364 = vmatpush3.xpose.msra.mxu1 %v945_v33  ;;  %3371 = vmatpush3.xpose.msra.mxu0 %v1028_v37 }
 0x12f   : > { %3375 = vmatprep.subr.mxu1 %v3748_v62  ;;  %3382 = vmatprep.subr.mxu0 %v3748_v62 }
 0x131   : > { %3366 = vmatmul.mubr.f32.vlgmr.msra.gmra.mxu1 %v4087_v23  ;;  %3373 = vmatmul.mubr.f32.vlgmr.msra.gmra.mxu0 %v4081_v9 }
 0x132   : > { %3376 = vmatpush3.xpose.msra.mxu1 %v942_v28  ;;  %3379 = vmatprep.mubr.msk.f32.mxu1 %vm3749_vm1, %v3748_v62  ;;  %v4189_v28 = vsub.f32 %v1856_v14, %v4170_v19 }
 0x133   : > { %3377 = vmatprep.subr.mxu1 %v3748_v62  ;;  %3383 = vmatpush3.msra.mxu0 %v4115_v42 }
 0x134   : > { %3384 = vmatprep.subr.mxu0 %v3748_v62  ;;  %3386 = vmatprep.mubr.msk.f32.mxu0 %vm3749_vm1, %v3748_v62  ;;  %v1971_v35 = vand.u32 4294901760, %v4189_v28 }
 0x135   : > { %3385 = vmatpush3.msra.mxu0 %v4122_v43 }
 0x136   : > { %3378 = vmatpush3.xpose.msra.mxu1 %v945_v33  ;;  %3396 = vmatprep.subr.mxu0 %v3748_v62  ;;  %v4198_v33 = vsub.f32 %v1855_v20, %v4182_v24 }
 0x137   : > { %3389 = vmatprep.subr.mxu1 %v3748_v62 }
 0x138   : > { %v1978_v40 = vand.u32 4294901760, %v4198_v33 }
 0x139   : > { %3380 = vmatmul.mubr.f32.vlgmr.msra.gmra.mxu1 %v4081_v9 }
 0x13a   : > { %3393 = vmatprep.mubr.msk.f32.mxu1 %vm3749_vm1, %v3748_v62  ;;  %3390 = vmatpush3.msra.mxu1 %v1497_v11 }
 0x13b   : > { %3391 = vmatprep.subr.mxu1 %v3748_v62 }
 0x13c   : > { %3392 = vmatpush3.msra.mxu1 %v1504_v12 }
 0x13d   : > { %3403 = vmatprep.subr.mxu1 %v3748_v62 }
 0x1e1   : > { %v986_v44 = vpop.f32.mrf.mxu0 }
 0x1e3   : > { %v3346_v45 = vpop.f32.mrf.mxu0 }
 0x1e9   : > { %v1067_v46 = vpop.f32.mrf.mxu1  ;;  %v1143_v47 = vpop.f32.mrf.mxu0 }
 0x1ea   : > { %v1068_v50 = vadd.f32 %v1067_v46, %v986_v44  ;;  %v1972_v44 = vsub.f32 %v4189_v28, %v1971_v35 }
 0x1eb   : > { %v3353_v48 = vpop.f32.mrf.mxu1  ;;  %v3360_v49 = vpop.f32.mrf.mxu0 }
 0x1ec   : > { %v1144_v53 = vadd.f32 %v1143_v47, %v1068_v50  ;;  %v1973_v45 = vand.u32 4294901760, %v1972_v44  ;;  %v1851_v50 = vld [vmem:[%s4593_s3 + $0x28] sm:$0xff] }
 0x1f1   : > { %v1218_v51 = vpop.f32.mrf.mxu1  ;;  %v1295_v52 = vpop.f32.mrf.mxu0 }
 0x1f2   : > { %v1219_v56 = vadd.f32 %v1218_v51, %v1144_v53  ;;  %v4332_v53 = vand.u32 4294901760, %v1851_v50 }
 0x1f3   : > { %v3367_v54 = vpop.f32.mrf.mxu1  ;;  %v3374_v55 = vpop.f32.mrf.mxu0 }
 0x1f4   : > { %v1296_v57 = vadd.f32 %v1295_v52, %v1219_v56  ;;  %v1850_v54 = vld [vmem:[%s4593_s3 + $0x20] sm:$0xff] }
 0x1f9   : > { %v1368_v58 = vpop.f32.mrf.mxu1 }
 0x1fa   : > { %v1369_v59 = vadd.f32 %v1368_v58, %v1296_v57  ;;  %v4344_v57 = vsub.f32 %v1851_v50, %v4332_v53  ;;  %v4346_v58 = vand.u32 4294901760, %v1850_v54 }
 0x1fb   : > { %v3381_v60 = vpop.f32.mrf.mxu1 }
 0x1fc   : > { %v1373_v61 = vsel %vm1372_vm3, %v1369_v59, -inf }
 0x1fd   : > { %1374 = vmax.xlane.f32.xlu0 %v1373_v61 }
 0x286   : > { %v1375_v63 = vpop.xlane.xlu0 %1374 }
 0x287   : > { %v1376_v0 = vsub.f32 %v1369_v59, %v1375_v63  ;;  %v1849_v59 = vld [vmem:[%s4593_s3 + $0x18] sm:$0xff]  ;;  %v2462_v63 = vand.u32 4294901760, %v4344_v57 }
 0x289   : > { %v1377_v1 = vmul.f32 1.442695, %v1376_v0  ;;  %v4358_v0 = vsub.f32 %v1850_v54, %v4346_v58 }
 0x28b   : > { %3650 = vpow2.f32 %v1377_v1  ;;  %v4361_v1 = vand.u32 4294901760, %v1849_v59 }
 0x298   : > { %v3651_v2 = vpop.eup %3650 }
 0x299   : > { %v1379_v3 = vsel %vm1372_vm3, %v3651_v2, 0.0 }
 0x29a   : > { %1380 = vadd.xlane.f32.xlu0 %v1379_v3 }
 0x323   : > { %v1381_v26 = vpop.xlane.xlu0 %1380 }
 0x324   : > { %3652 = vrcp.f32 %v1381_v26  ;;  %v4387_v26 = vand.u32 4294901760, %v1847_v8 }
 0x331   : > { %v3653_v15 = vpop.eup %3652 }
 0x332   : > { %v1383_v17 = vmul.f32 %v3653_v15, %v3651_v2  ;;  %v1848_v2 = vld [vmem:[%s4593_s3 + $0x10] sm:$0xff] }
 0x334   : > { %v1385_v21 = vsel %vm1372_vm3, %v1383_v17, 0  ;;  %2893 = vst.msk [vmem:[%s4178_s18] sm:$0xff] %vm1372_vm3, %v1383_v17  ;;  %v4398_v17 = vsub.f32 %v1847_v8, %v4387_v26 }
 0x335   : > { %v1454_v22 = vand.u32 4294901760, %v1385_v21 }
 0x337   : > { %v1455_v29 = vsub.f32 %v1385_v21, %v1454_v22  ;;  %3394 = vmatmul.mubr.f32.vlgmr.msra.gmra.mxu1 %v1454_v22  ;;  %v2490_v21 = vand.u32 4294901760, %v4398_v17 }
 0x338   : > { %3404 = vmatpush3.msra.mxu1 %v4115_v42  ;;  %3407 = vmatprep.mubr.msk.f32.mxu1 %vm3749_vm1, %v3748_v62 }
 0x339   : > { %3405 = vmatprep.subr.mxu1 %v3748_v62  ;;  %v1456_v31 = vand.u32 4294901760, %v1455_v29 }
 0x33a   : > { %3406 = vmatpush3.msra.mxu1 %v4122_v43 }
 0x33b   : > { %3408 = vmatmul.mubr.f32.vlgmr.msra.gmra.mxu1 %v1456_v31  ;;  %3417 = vmatprep.subr.mxu1 %v3748_v62  ;;  %v1457_v37 = vsub.f32 %v1455_v29, %v1456_v31 }
 0x33c   : > { %3418 = vmatpush3.msra.mxu1 %v4115_v42  ;;  %3421 = vmatprep.mubr.msk.f32.mxu1 %vm3749_vm1, %v3748_v62  ;;  %v1985_v42 = vand.u32 4294901760, %v4210_v38 }
 0x33d   : > { %3419 = vmatprep.subr.mxu1 %v3748_v62  ;;  %v1458_v39 = vand.u32 4294901760, %v1457_v37 }
 0x33e   : > { %3420 = vmatpush3.msra.mxu1 %v4122_v43  ;;  %v1979_v43 = vsub.f32 %v4198_v33, %v1978_v40  ;;  %v1986_v46 = vsub.f32 %v4210_v38, %v1985_v42 }
 0x33f   : > { %3387 = vmatmul.mubr.f32.vlgmr.msra.gmra.mxu0 %v1458_v39  ;;  %3422 = vmatmul.mubr.f32.vlgmr.msra.gmra.mxu1 %v1454_v22 }
 0x340   : > { %3397 = vmatpush3.msra.mxu0 %v4143_v5  ;;  %3400 = vmatprep.mubr.msk.f32.mxu0 %vm3749_vm1, %v3748_v62  ;;  %v1980_v47 = vand.u32 4294901760, %v1979_v43  ;;  %v1987_v48 = vand.u32 4294901760, %v1986_v46  ;;  %v2469_v5 = vand.u32 4294901760, %v4358_v0 }
 0x341   : > { %3398 = vmatprep.subr.mxu0 %v3748_v62  ;;  %3435 = vmatprep.subr.mxu1 %v3748_v62 }
 0x342   : > { %3399 = vmatpush3.msra.mxu0 %v4139_v4  ;;  %3436 = vmatpush3.msra.mxu1 %v1966_v41  ;;  %v2463_v4 = vsub.f32 %v4344_v57, %v2462_v63  ;;  %v2470_v11 = vsub.f32 %v4358_v0, %v2469_v5 }
 0x343   : > { %3410 = vmatprep.subr.mxu0 %v3748_v62  ;;  %3401 = vmatmul.mubr.f32.vlgmr.msra.gmra.mxu0 %v1455_v29 }
 0x344   : > { %3411 = vmatpush3.msra.mxu0 %v1495_v7  ;;  %3414 = vmatprep.mubr.msk.f32.mxu0 %vm3749_vm1, %v3748_v62  ;;  %v4375_v7 = vsub.f32 %v1849_v59, %v4361_v1  ;;  %v2464_v10 = vand.u32 4294901760, %v2463_v4  ;;  %v2471_v14 = vand.u32 4294901760, %v2470_v11 }
 0x345   : > { %3412 = vmatprep.subr.mxu0 %v3748_v62  ;;  %3437 = vmatprep.subr.mxu1 %v3748_v62 }
 0x346   : > { %3413 = vmatpush3.msra.mxu0 %v1502_v6  ;;  %3438 = vmatpush3.msra.mxu1 %v1973_v45  ;;  %v4371_v6 = vand.u32 4294901760, %v1848_v2  ;;  %v2476_v32 = vand.u32 4294901760, %v4375_v7 }
 0x347   : > { %3415 = vmatmul.mubr.f32.vlgmr.msra.gmra.mxu0 %v1454_v22  ;;  %3424 = vmatprep.subr.mxu0 %v3748_v62 }
 0x348   : > { %3425 = vmatpush3.msra.mxu0 %v4161_v13  ;;  %3439 = vmatprep.subr.mxu1 %v3748_v62  ;;  %v4385_v12 = vsub.f32 %v1848_v2, %v4371_v6 }
 0x349   : > { %3426 = vmatprep.subr.mxu0 %v3748_v62  ;;  %3440 = vmatpush3.msra.mxu1 %v1980_v47 }
 0x34a   : > { %3427 = vmatpush3.msra.mxu0 %v4170_v19  ;;  %3441 = vmatprep.subr.mxu1 %v3748_v62  ;;  %v2483_v15 = vand.u32 4294901760, %v4385_v12 }
 0x34b   : > { %3428 = vmatprep.subr.mxu0 %v3748_v62  ;;  %3432 = vmatprep.mubr.msk.f32.mxu0 %vm3749_vm1, %v3748_v62 }
 0x34c   : > { %3429 = vmatpush3.msra.mxu0 %v4182_v24  ;;  %3442 = vmatpush3.msra.mxu1 %v1987_v48  ;;  %v2484_v20 = vsub.f32 %v4385_v12, %v2483_v15 }
 0x34d   : > { %3430 = vmatprep.subr.mxu0 %v3748_v62  ;;  %3443 = vmatprep.mubr.msk.f32.mxu1 %vm3749_vm1, %v3748_v62 }
 0x34e   : > { %3431 = vmatpush3.msra.mxu0 %v4194_v30  ;;  %3457 = vmatprep.subr.mxu1 %v3748_v62  ;;  %v2485_v25 = vand.u32 4294901760, %v2484_v20 }
 0x34f   : > { %3446 = vmatprep.subr.mxu0 %v3748_v62  ;;  %3433 = vmatmul.mubr.f32.vlgmr.msra.gmra.mxu0 %v4094_v36  ;;  %v1852_v36 = vld [vmem:[%s4593_s3 + $0x30] sm:$0xff] }
 0x350   : > { %3447 = vmatpush3.msra.mxu0 %v4168_v18  ;;  %3444 = vmatmul.mubr.f32.vlgmr.msra.gmra.mxu1 %v4081_v9  ;;  %v4321_v49 = vand.u32 4294901760, %v1852_v36 }
 0x351   : > { %3448 = vmatprep.subr.mxu0 %v3748_v62  ;;  %3458 = vmatpush3.msra.mxu1 %v4161_v13 }
 0x352   : > { %3449 = vmatpush3.msra.mxu0 %v4189_v28  ;;  %3459 = vmatprep.subr.mxu1 %v3748_v62  ;;  %v4330_v52 = vsub.f32 %v1852_v36, %v4321_v49 }
 0x353   : > { %3450 = vmatprep.subr.mxu0 %v3748_v62  ;;  %3460 = vmatpush3.msra.mxu1 %v4170_v19 }
 0x354   : > { %3451 = vmatpush3.msra.mxu0 %v4198_v33  ;;  %3461 = vmatprep.subr.mxu1 %v3748_v62  ;;  %v2455_v56 = vand.u32 4294901760, %v4330_v52 }
 0x355   : > { %3452 = vmatprep.subr.mxu0 %v3748_v62  ;;  %3462 = vmatpush3.msra.mxu1 %v4182_v24 }
 0x356   : > { %3453 = vmatpush3.msra.mxu0 %v4210_v38  ;;  %3463 = vmatprep.subr.mxu1 %v3748_v62  ;;  %v2456_v61 = vsub.f32 %v4330_v52, %v2455_v56 }
 0x357   : > { %3454 = vmatprep.mubr.msk.f32.mxu0 %vm3749_vm1, %v3748_v62  ;;  %3464 = vmatpush3.msra.mxu1 %v4194_v30 }
 0x358   : > { %3468 = vmatprep.subr.mxu0 %v3748_v62  ;;  %3455 = vmatmul.mubr.f32.vlgmr.msra.gmra.mxu0 %v4084_v16  ;;  %v1853_v16 = vld [vmem:[%s4593_s3 + $0x38] sm:$0xff]  ;;  %v2457_v3 = vand.u32 4294901760, %v2456_v61 }
 0x359   : > { %3465 = vmatprep.mubr.msk.f32.mxu1 %vm3749_vm1, %v3748_v62  ;;  %3469 = vmatpush3.msra.mxu0 %v1964_v27  ;;  %v2491_v27 = vsub.f32 %v4398_v17, %v2490_v21 }
 0x35a   : > { %3479 = vmatprep.subr.mxu1 %v3748_v62  ;;  %3466 = vmatmul.mubr.f32.vlgmr.msra.gmra.mxu1 %v4087_v23  ;;  %v4313_v23 = vand.u32 4294901760, %v1853_v16 }
 0x35b   : > { %3470 = vmatprep.subr.mxu0 %v3748_v62  ;;  %3480 = vmatpush3.msra.mxu1 %v4161_v13  ;;  %v1846_v13 = vld [vmem:[%s4593_s3] sm:$0xff]  ;;  %v2492_v29 = vand.u32 4294901760, %v2491_v27 }
 0x35c   : > { %3471 = vmatpush3.msra.mxu0 %v1971_v35  ;;  %3481 = vmatprep.subr.mxu1 %v3748_v62  ;;  %v4400_v18 = vand.u32 4294901760, %v1846_v13 }
 0x35d   : > { %3472 = vmatprep.subr.mxu0 %v3748_v62  ;;  %3482 = vmatpush3.msra.mxu1 %v4170_v19  ;;  %v2477_v19 = vsub.f32 %v4375_v7, %v2476_v32 }
 0x35e   : > { %3473 = vmatpush3.msra.mxu0 %v1978_v40  ;;  %3483 = vmatprep.subr.mxu1 %v3748_v62  ;;  %v4413_v22 = vsub.f32 %v1846_v13, %v4400_v18 }
 0x35f   : > { %3474 = vmatprep.subr.mxu0 %v3748_v62  ;;  %3484 = vmatpush3.msra.mxu1 %v4182_v24  ;;  %v2478_v24 = vand.u32 4294901760, %v2477_v19 }
 0x360   : > { %3475 = vmatpush3.msra.mxu0 %v1985_v42  ;;  %3476 = vmatprep.mubr.msk.f32.mxu0 %vm3749_vm1, %v3748_v62  ;;  %v2497_v28 = vand.u32 4294901760, %v4413_v22 }
 0x361   : > { %3485 = vmatprep.subr.mxu1 %v3748_v62  ;;  %3477 = vmatmul.mubr.f32.vlgmr.msra.gmra.mxu0 %v4081_v9 }
 0x362   : > { %3486 = vmatpush3.msra.mxu1 %v4194_v30  ;;  %3487 = vmatprep.mubr.msk.f32.mxu1 %vm3749_vm1, %v3748_v62  ;;  %v2498_v30 = vsub.f32 %v4413_v22, %v2497_v28 }
 0x363   : > { %3509 = vmatprep.subr.mxu1 %v3748_v62  ;;  %3488 = vmatmul.mubr.f32.vlgmr.msra.gmra.mxu1 %v4081_v9  ;;  %v4319_v9 = vsub.f32 %v1853_v16, %v4313_v23 }
 0x364   : > { %3490 = vmatprep.subr.mxu0 %v3748_v62  ;;  %3525 = vmatprep.mubr.msk.f32.mxu1 %vm3749_vm1, %v3748_v62  ;;  %v2499_v31 = vand.u32 4294901760, %v2498_v30 }
 0x365   : > { %3506 = vmatprep.mubr.msk.f32.mxu0 %vm3749_vm1, %v3748_v62  ;;  %3491 = vmatpush3.msra.mxu0 %v4313_v23  ;;  %v2448_v51 = vand.u32 4294901760, %v4319_v9 }
 0x366   : > { %3492 = vmatprep.subr.mxu0 %v3748_v62 }
 0x367   : > { %3493 = vmatpush3.msra.mxu0 %v4321_v49  ;;  %v2449_v55 = vsub.f32 %v4319_v9, %v2448_v51 }
 0x368   : > { %3494 = vmatprep.subr.mxu0 %v3748_v62 }
 0x369   : > { %3495 = vmatpush3.msra.mxu0 %v4332_v53  ;;  %v2450_v60 = vand.u32 4294901760, %v2449_v55 }
 0x36a   : > { %3496 = vmatprep.subr.mxu0 %v3748_v62 }
 0x36b   : > { %3497 = vmatpush3.msra.mxu0 %v4346_v58  ;;  %3510 = vmatpush3.msra.mxu1 %v2450_v60 }
 0x36c   : > { %3498 = vmatprep.subr.mxu0 %v3748_v62  ;;  %3511 = vmatprep.subr.mxu1 %v3748_v62 }
 0x36d   : > { %3499 = vmatpush3.msra.mxu0 %v4361_v1  ;;  %3512 = vmatpush3.msra.mxu1 %v2457_v3 }
 0x36e   : > { %3500 = vmatprep.subr.mxu0 %v3748_v62  ;;  %3513 = vmatprep.subr.mxu1 %v3748_v62 }
 0x36f   : > { %3501 = vmatpush3.msra.mxu0 %v4371_v6  ;;  %3514 = vmatpush3.msra.mxu1 %v2464_v10 }
 0x370   : > { %3502 = vmatprep.subr.mxu0 %v3748_v62  ;;  %3515 = vmatprep.subr.mxu1 %v3748_v62 }
 0x371   : > { %3503 = vmatpush3.msra.mxu0 %v4387_v26  ;;  %3516 = vmatpush3.msra.mxu1 %v2471_v14 }
 0x372   : > { %3504 = vmatprep.subr.mxu0 %v3748_v62  ;;  %3517 = vmatprep.subr.mxu1 %v3748_v62 }
 0x373   : > { %3505 = vmatpush3.msra.mxu0 %v4400_v18  ;;  %3518 = vmatpush3.msra.mxu1 %v2478_v24 }
 0x374   : > { %3528 = vmatprep.subr.mxu0 %v3748_v62  ;;  %3519 = vmatprep.subr.mxu1 %v3748_v62 }
 0x375   : > { %3520 = vmatpush3.msra.mxu1 %v2485_v25 }
 0x376   : > { %3521 = vmatprep.subr.mxu1 %v3748_v62 }
 0x377   : > { %3522 = vmatpush3.msra.mxu1 %v2492_v29 }
 0x378   : > { %3523 = vmatprep.subr.mxu1 %v3748_v62 }
 0x379   : > { %3524 = vmatpush3.msra.mxu1 %v2499_v31 }
 0x37a   : > { %3547 = vmatprep.subr.mxu1 %v3748_v62 }
 0x3f7   : > { %v1541_v33 = vpop.f32.mrf.mxu1 }
 0x3f9   : > { %v3395_v34 = vpop.f32.mrf.mxu1 }
 0x3fb   : > { %v1692_v35 = vpop.f32.mrf.mxu1 }
 0x3fd   : > { %v3409_v37 = vpop.f32.mrf.mxu1 }
 0x3ff   : > { %v1460_v38 = vpop.f32.mrf.mxu0  ;;  %v1842_v39 = vpop.f32.mrf.mxu1 }
 0x400   : > { %v1542_v44 = vadd.f32 %v1541_v33, %v1460_v38 }
 0x401   : > { %v3388_v40 = vpop.f32.mrf.mxu0  ;;  %v3423_v41 = vpop.f32.mrf.mxu1 }
 0x403   : > { %v1617_v42 = vpop.f32.mrf.mxu0 }
 0x404   : > { %v1618_v43 = vadd.f32 %v1617_v42, %v1542_v44 }
 0x405   : > { %v3402_v45 = vpop.f32.mrf.mxu0 }
 0x406   : > { %v1693_v46 = vadd.f32 %v1692_v35, %v1618_v43 }
 0x407   : > { %v1769_v47 = vpop.f32.mrf.mxu0 }
 0x408   : > { %v1770_v48 = vadd.f32 %v1769_v47, %v1693_v46 }
 0x409   : > { %v3416_v16 = vpop.f32.mrf.mxu0 }
 0x40a   : > { %v1843_v36 = vadd.f32 %v1842_v39, %v1770_v48 }
 0x40c   : > { %v2344_v50 = vsel %vm316_vm0, %v1843_v36, 0 }
 0x40d   : > { %v4431_v54 = vand.u32 4294901760, %v2344_v50 }
 0x40f   : > { %v4434_v55 = vsub.f32 %v2344_v50, %v4431_v54  ;;  %3526 = vmatmul.mubr.f32.vlgmr.msra.gmra.mxu1 %v4431_v54  ;;  %v1933_v59 = vpop.f32.mrf.mxu0 }
 0x410   : > { %3548 = vmatpush3.msra.mxu1 %v4313_v23  ;;  %3563 = vmatprep.mubr.msk.f32.mxu1 %vm3749_vm1, %v3748_v62  ;;  %v2024_v60 = vpop.f32.mrf.mxu1 }
 0x411   : > { %3549 = vmatprep.subr.mxu1 %v3748_v62  ;;  %v2421_v61 = vand.u32 4294901760, %v4434_v55  ;;  %v3434_v2 = vpop.f32.mrf.mxu0  ;;  %v2025_v3 = vadd.f32 %v2024_v60, %v1933_v59 }
 0x412   : > { %3550 = vmatpush3.msra.mxu1 %v4321_v49  ;;  %v3445_v4 = vpop.f32.mrf.mxu1 }
 0x413   : > { %3551 = vmatprep.subr.mxu1 %v3748_v62  ;;  %v2422_v8 = vsub.f32 %v4434_v55, %v2421_v61 }
 0x414   : > { %3552 = vmatpush3.msra.mxu1 %v4332_v53 }
 0x415   : > { %3553 = vmatprep.subr.mxu1 %v3748_v62  ;;  %v2423_v10 = vand.u32 4294901760, %v2422_v8 }
 0x416   : > { %3554 = vmatpush3.msra.mxu1 %v4346_v58 }
 0x417   : > { %3555 = vmatprep.subr.mxu1 %v3748_v62  ;;  %3507 = vmatmul.mubr.f32.vlgmr.msra.gmra.mxu0 %v2423_v10 }
 0x418   : > { %3529 = vmatpush3.msra.mxu0 %v4319_v9  ;;  %3556 = vmatpush3.msra.mxu1 %v4361_v1  ;;  %v2104_v11 = vpop.f32.mrf.mxu0 }
 0x419   : > { %3530 = vmatprep.subr.mxu0 %v3748_v62  ;;  %3557 = vmatprep.subr.mxu1 %v3748_v62  ;;  %v2105_v13 = vadd.f32 %v2104_v11, %v2025_v3 }
 0x41a   : > { %3531 = vmatpush3.msra.mxu0 %v4330_v52  ;;  %3558 = vmatpush3.msra.mxu1 %v4371_v6  ;;  %v3456_v14 = vpop.f32.mrf.mxu0  ;;  %v2181_v19 = vpop.f32.mrf.mxu1 }
 0x41b   : > { %3532 = vmatprep.subr.mxu0 %v3748_v62  ;;  %3559 = vmatprep.subr.mxu1 %v3748_v62  ;;  %v2182_v20 = vadd.f32 %v2181_v19, %v2105_v13 }
 0x41c   : > { %3533 = vmatpush3.msra.mxu0 %v4344_v57  ;;  %3560 = vmatpush3.msra.mxu1 %v4387_v26  ;;  %v3467_v24 = vpop.f32.mrf.mxu1 }
 0x41d   : > { %3534 = vmatprep.subr.mxu0 %v3748_v62  ;;  %3561 = vmatprep.subr.mxu1 %v3748_v62 }
 0x41e   : > { %3535 = vmatpush3.msra.mxu0 %v4358_v0  ;;  %3562 = vmatpush3.msra.mxu1 %v4400_v18 }
 0x41f   : > { %3536 = vmatprep.subr.mxu0 %v3748_v62  ;;  %3564 = vmatmul.mubr.f32.vlgmr.msra.gmra.mxu1 %v2421_v61 }
 0x420   : > { %3585 = vmatprep.subr.mxu1 %v3748_v62  ;;  %3537 = vmatpush3.msra.mxu0 %v4375_v7 }
 0x421   : > { %3586 = vmatpush3.msra.mxu1 %v4313_v23  ;;  %3538 = vmatprep.subr.mxu0 %v3748_v62  ;;  %v2264_v25 = vpop.f32.mrf.mxu0 }
 0x422   : > { %3587 = vmatprep.subr.mxu1 %v3748_v62  ;;  %3539 = vmatpush3.msra.mxu0 %v4385_v12  ;;  %v2265_v27 = vadd.f32 %v2264_v25, %v2182_v20 }
 0x423   : > { %3588 = vmatpush3.msra.mxu1 %v4321_v49  ;;  %3540 = vmatprep.subr.mxu0 %v3748_v62  ;;  %v2339_v29 = vpop.f32.mrf.mxu1  ;;  %v3478_v30 = vpop.f32.mrf.mxu0 }
 0x424   : > { %3589 = vmatprep.subr.mxu1 %v3748_v62  ;;  %3541 = vmatpush3.msra.mxu0 %v4398_v17  ;;  %v4474_v31 = vadd.f32 %v2339_v29, %v2265_v27 }
 0x425   : > { %3590 = vmatpush3.msra.mxu1 %v4332_v53  ;;  %3542 = vmatprep.subr.mxu0 %v3748_v62  ;;  %v3489_v23 = vpop.f32.mrf.mxu1 }
 0x426   : > { %3591 = vmatprep.subr.mxu1 %v3748_v62  ;;  %3543 = vmatpush3.msra.mxu0 %v4413_v22 }
 0x427   : > { %3544 = vmatprep.mubr.msk.f32.mxu0 %vm3749_vm1, %v3748_v62  ;;  %3592 = vmatpush3.msra.mxu1 %v4346_v58 }
 0x428   : > { %3545 = vmatmul.mubr.f32.vlgmr.msra.gmra.mxu0 %v4434_v55  ;;  %3566 = vmatprep.subr.mxu0 %v3748_v62 }
 0x429   : > { %3593 = vmatprep.subr.mxu1 %v3748_v62  ;;  %3567 = vmatpush3.msra.mxu0 %v2448_v51 }
 0x42a   : > { %3594 = vmatpush3.msra.mxu1 %v4361_v1  ;;  %3568 = vmatprep.subr.mxu0 %v3748_v62 }
 0x42b   : > { %3595 = vmatprep.subr.mxu1 %v3748_v62  ;;  %3569 = vmatpush3.msra.mxu0 %v2455_v56 }
 0x42c   : > { %3596 = vmatpush3.msra.mxu1 %v4371_v6  ;;  %3570 = vmatprep.subr.mxu0 %v3748_v62 }
 0x42d   : > { %3597 = vmatprep.subr.mxu1 %v3748_v62  ;;  %3571 = vmatpush3.msra.mxu0 %v2462_v63 }
 0x42e   : > { %3598 = vmatpush3.msra.mxu1 %v4387_v26  ;;  %3572 = vmatprep.subr.mxu0 %v3748_v62 }
 0x42f   : > { %3599 = vmatprep.subr.mxu1 %v3748_v62  ;;  %3573 = vmatpush3.msra.mxu0 %v2469_v5 }
 0x430   : > { %3600 = vmatpush3.msra.mxu1 %v4400_v18  ;;  %3601 = vmatprep.mubr.msk.f32.mxu1 %vm3749_vm1, %v3748_v62 }
 0x431   : > { %3574 = vmatprep.subr.mxu0 %v3748_v62  ;;  %3602 = vmatmul.mubr.f32.vlgmr.msra.gmra.mxu1 %v4431_v54 }
 0x432   : > { %3575 = vmatpush3.msra.mxu0 %v2476_v32  ;;  %3582 = vmatprep.mubr.msk.f32.mxu0 %vm3749_vm1, %v3748_v62 }
 0x433   : > { %3576 = vmatprep.subr.mxu0 %v3748_v62 }
 0x434   : > { %3577 = vmatpush3.msra.mxu0 %v2483_v15 }
 0x435   : > { %3578 = vmatprep.subr.mxu0 %v3748_v62 }
 0x436   : > { %3579 = vmatpush3.msra.mxu0 %v2490_v21 }
 0x437   : > { %3580 = vmatprep.subr.mxu0 %v3748_v62 }
 0x438   : > { %3581 = vmatpush3.msra.mxu0 %v2497_v28 }
 0x439   : > { %3583 = vmatmul.mubr.f32.vlgmr.msra.gmra.mxu0 %v4431_v54 }
 0x43a   : > { %3669 = shalt.err (!%p3666_p3)
}
 0x43b   : > { %s3670_s8 = scalar_lea.hbm %s2924_s17, 128  ;;  %s3674_s16 = scalar_lea.hbm %s4597_s7, 256 }
 0x43c   : > { %p3671_p4 = scmp.ne.s32.totalorder %s2924_s17, %s3670_s8  ;;  %p3675_p9 = scmp.lt.s32.totalorder %s2924_s17, %s4597_s7 }
 0x43d   : > { %p3676_p10 = scmp.lt.s32.totalorder %s3674_s16, %s3670_s8 }
 0x43e   : > { %p3672_p7 = pnand %p3671_p4, %p3830_p5 }
 0x43f   : > { %p3677_p11 = por %p3676_p10, %p3675_p9 }
 0x440   : > { %p3673_p8 = pneg %p3672_p7 }
 0x442   : > { %p3678_p12 = pnand %p3677_p11, %p3673_p8 }
 0x444   : > { %3681 = shalt.err (!%p3678_p12)
}
 0x445   : > { %3605 = dma.vmem_to_hbm [thread:$0]  (%p3830_p5), %s2927_s19, 128, %s2924_s17, %s2900_s20   ;;  %v3038_v26 = vld [vmem:[%s4595_s5] ss:$0 sm:$0xff] }
 0x446   : > { %s4602_s17 = sshll.u32 %s4159_s9, 3  ;;  %s4603_s21 = sshll.u32 %s3813_s28, 7 }
 0x447   : > { %s288_s19 = scalar_lea.vmem [#allocation2], %s4602_s17  ;;  %s4553_s29 = scalar_lea.hbm %s4596_s6, %s4603_s21 }
 0x448   : > { %s2913_s20 = sshll.u32 %s288_s19, 4  ;;  %s2895_s8 = scalar_lea.sflag [#allocation3], %s4159_s9  ;;  %s2914_s20 = int_to_ptr.vmem [resolvable:$true] %s2913_s20 }
 0x449   : > { %s3682_s18 = scalar_lea.vmem %s2914_s20, 128  ;;  %s3751_s15 = smov [#allocation2]  }
 0x44a   : > { %p3683_p13 = scmp.ne.s32.totalorder %s2914_s20, %s3682_s18  ;;  %s3686_s16 = sshll.u32 %s3751_s15, 4  ;;  %s3687_s16 = int_to_ptr.vmem [resolvable:$false] %s3686_s16 }
 0x44b   : > { %s3688_s13 = scalar_lea.vmem %s3687_s16, 256  ;;  %p3689_p2 = scmp.lt.s32.totalorder %s2914_s20, %s3687_s16 }
 0x44c   : > { %p3684_p0 = pnand %p3683_p13, %p3830_p5  ;;  %p3690_p3 = scmp.lt.s32.totalorder %s3688_s13, %s3682_s18 }
 0x44e   : > { %p3685_p1 = pneg %p3684_p0  ;;  %p3691_p4 = por %p3690_p3, %p3689_p2 }
 0x450   : > { %p3692_p7 = pnand %p3691_p4, %p3685_p1 }
 0x4cf   : > { %v2536_v62 = vpop.f32.mrf.mxu1 }
 0x4d1   : > { %v3527_v9 = vpop.f32.mrf.mxu1 }
 0x4d7   : > { %v2425_v49 = vpop.f32.mrf.mxu0 }
 0x4d8   : > { %v2426_v58 = vadd.f32 %v2425_v49, %v4474_v31 }
 0x4d9   : > { %v3508_v51 = vpop.f32.mrf.mxu0 }
 0x4da   : > { %v2537_v0 = vadd.f32 %v2536_v62, %v2426_v58 }
 0x4df   : > { %v2705_v52 = vpop.f32.mrf.mxu1 }
 0x4e1   : > { %v3565_v53 = vpop.f32.mrf.mxu1 }
 0x4e8   : > { %v2624_v56 = vpop.f32.mrf.mxu0 }
 0x4e9   : > { %v2625_v5 = vadd.f32 %v2624_v56, %v2537_v0 }
 0x4ea   : > { %v3546_v57 = vpop.f32.mrf.mxu0 }
 0x4eb   : > { %v2706_v6 = vadd.f32 %v2705_v52, %v2625_v5 }
 0x4f1   : > { %v2879_v63 = vpop.f32.mrf.mxu1 }
 0x4f3   : > { %v3603_v1 = vpop.f32.mrf.mxu1 }
 0x4f9   : > { %v2800_v7 = vpop.f32.mrf.mxu0 }
 0x4fa   : > { %v2801_v12 = vadd.f32 %v2800_v7, %v2706_v6 }
 0x4fb   : > { %v3584_v32 = vpop.f32.mrf.mxu0 }
 0x4fc   : > { %v2880_v15 = vadd.f32 %v2879_v63, %v2801_v12 }
 0x4fe   : > { %v2890_v17 = vadd.f32 %v3038_v26, %v2880_v15 }
 0x500   : > { %3654 = vtanh.f32 %v2890_v17 }
 0x50d   : > { %v3655_v18 = vpop.eup %3654 }
 0x50e   : > { %2892 = vst.msk [vmem:[%s288_s19] sm:$0xff] %vm903_vm2, %v3655_v18 }
 0x50f   : > { %3695 = shalt.err (!%p3692_p7)
}
 0x510   : > { %s3696_s28 = scalar_lea.hbm %s4553_s29, 128  ;;  %s3700_s17 = scalar_lea.hbm %s4596_s6, 256 }
 0x511   : > { %p3697_p8 = scmp.ne.s32.totalorder %s4553_s29, %s3696_s28  ;;  %p3701_p11 = scmp.lt.s32.totalorder %s4553_s29, %s4596_s6 }
 0x512   : > { %p3702_p12 = scmp.lt.s32.totalorder %s3700_s17, %s3696_s28 }
 0x513   : > { %p3698_p9 = pnand %p3697_p8, %p3830_p5 }
 0x514   : > { %p3703_p13 = por %p3702_p12, %p3701_p11 }
 0x515   : > { %p3699_p10 = pneg %p3698_p9 }
 0x517   : > { %p3704_p0 = pnand %p3703_p13, %p3699_p10 }
 0x519   : > { %3707 = shalt.err (!%p3704_p0)
}
 0x51a   : > { %3604 = dma.vmem_to_hbm [thread:$0]  (%p3830_p5), %s2914_s20, 128, %s4553_s29, %s2895_s8  }
 0x51b PF: > { %p3615_p1 = scmp.ge.s32.totalorder %s3746_s27, 2  ;;  %s2938_s22 = sand.u32 1, %s3734_s24  }
 0x51c   : > { %s2939_s23 = scalar_lea.sflag [#allocation3], %s2938_s22 }
 0x51d   : > { %p3609_p2 = pnand %p3615_p1, %p3834_p6 }
 0x51f   : > { %p3610_p3 = pneg %p3609_p2 }
 0x521   : > { %3725 = dma.done.wait (%p3610_p3), %s2939_s23, 128  }
 0x522   : > { %3727 = vsyncadd (%p3610_p3), %s2939_s23, 4294967168  ;;  %s2948_s18 = scalar_lea.sflag [#allocation5], %s2938_s22 }
 0x523   : > { %3729 = dma.done.wait (%p3610_p3), %s2948_s18, 128  }
 0x524   : > { %3731 = vsyncadd (%p3610_p3), %s2948_s18, 4294967168  ;;  %p21_p5 = scmp.ge.s32.totalorder %s3817_s30, 4   ;;  %s4604_s24 = smov %s3738_s25 }
 0x525   : > { %s4605_s25 = smov %s3742_s26  ;;  %s4606_s26 = smov %s3828_s10 }
 0x526   : > { %s4607_s27 = smov %s3817_s30  ;;  %23 = sbr.rel (!%p21_p5) target bundleno = 5 (0x5), region = 99 }
 0x52b   :  { %2953 = vsyncpa [#allocation3], 1 }
 0x52c   :  { %2955 = vsyncpa [#allocation3 + $0x1], 1 }
 0x52d   :  { %2956 = vsyncpa [#allocation5], 1 }
 0x52e   :  { %2958 = vsyncpa [#allocation5 + $0x1], 1 }

</bundles_post_ra>
